<compile_context>
chip_gen: v7x
topology: tpu7x:2x2x1
jax: 0.10.0
libtpu: 0.0.40
codegen_flags: <defaults>
</compile_context>

<pallas_src>
import jax
import jax.numpy as jnp
from jax.experimental import pallas as pl
from jax.experimental.pallas import tpu as pltpu


def _gated_classifier_kernel(
    x1_ref, x2_ref,
    wv_ref, bv_ref, wt_ref, bt_ref,
    wg1_ref, wg2_ref,
    wc_ref, bc_ref,
    y_ref, z_ref,
):
    f32 = jnp.float32

    # vismlp / textmlp: BatchNorm already folded into (wv, bv) / (wt, bt).
    vh = jnp.dot(x1_ref[...], wv_ref[...], preferred_element_type=f32) + bv_ref[...]
    th = jnp.dot(x2_ref[...], wt_ref[...], preferred_element_type=f32) + bt_ref[...]

    # Gated bimodal unit:  z = sigmoid([vh, th] @ Wg);  g = z*tanh(vh) + (1-z)*tanh(th)
    wdt = wg1_ref.dtype
    logits = (jnp.dot(vh.astype(wdt), wg1_ref[...], preferred_element_type=f32)
              + jnp.dot(th.astype(wdt), wg2_ref[...], preferred_element_type=f32))
    z = jax.nn.sigmoid(logits)
    th_t = jnp.tanh(th)
    g = th_t + z * (jnp.tanh(vh) - th_t)          # == z*tanh(vh) + (1-z)*tanh(th)

    # Classifier: L1/L2/L3 pre-multiplied into a single (H, O_pad) linear in the wrapper.
    a = jnp.dot(g.astype(wc_ref.dtype), wc_ref[...], preferred_element_type=f32) + bc_ref[...]
    y_ref[...] = jax.nn.sigmoid(a).astype(y_ref.dtype)
    z_ref[...] = z.astype(z_ref.dtype)


def _round_up(v, m):
    return (v + m - 1) // m * m


def _fold_batchnorm_linear(x, gamma, beta, w, b, eps):
    """Fold training-mode BatchNorm1d (batch statistics) + Linear into (w_eff, b_eff).

    Single fused pass over x: sum and sum-of-squares computed together (one HBM read)."""
    n = x.shape[0]
    xf = x.astype(jnp.float32)
    s1 = jnp.sum(xf, axis=0)
    s2 = jnp.sum(xf * xf, axis=0)
    mean = s1 / n
    var = jnp.maximum(s2 / n - mean * mean, 0.0)    # biased variance, as PyTorch normalizes with
    scale = gamma * jax.lax.rsqrt(var + eps)        # (D,)
    shift = beta - mean * scale                     # (D,)
    w_eff = scale[:, None] * w                      # (D, H)
    b_eff = shift @ w + b                           # (H,)
    return w_eff, b_eff


def _resident(shape):
    """VMEM-resident operand: constant index_map, single-buffered (never re-fetched)."""
    return pl.BlockSpec(shape, lambda i: (0, 0), pipeline_mode=pl.Buffered(1))


def gated_classifier_forward(x1, x2, params, *, block_b=None, eps=1e-5, out_dtype=None):
    """Full GatedClassifier forward. Returns (y_hat, z).

    x1: (B, Dv), x2: (B, Dt).  params hold JAX-layout weights (in_dim, out_dim)."""
    B, Dv = x1.shape
    B2, Dt = x2.shape
    assert B == B2
    H = params["w_gmu"].shape[1]
    O = params["w3"].shape[1]
    assert params["w_gmu"].shape == (2 * H, H)
    f32 = jnp.float32
    hi = jax.lax.Precision.HIGHEST

    # ---- fold BatchNorm into the first Linear layers (wrapper-side, one pass over x1/x2) ----
    wv, bv = _fold_batchnorm_linear(x1, params["bn_v_gamma"], params["bn_v_beta"],
                                    params["w_vis"], params["b_vis"], eps)
    wt, bt = _fold_batchnorm_linear(x2, params["bn_t_gamma"], params["bn_t_beta"],
                                    params["w_text"], params["b_text"], eps)
    wg1 = params["w_gmu"][:H]
    wg2 = params["w_gmu"][H:]

    # ---- pre-multiply the classifier chain (no intermediate nonlinearities) in f32 ----
    w1, w2, w3 = (params["w1"].astype(f32), params["w2"].astype(f32), params["w3"].astype(f32))
    b1, b2, b3 = (params["b1"].astype(f32), params["b2"].astype(f32), params["b3"].astype(f32))
    w_cls = jnp.dot(jnp.dot(w1, w2, precision=hi), w3, precision=hi)          # (H, O)
    b_cls = jnp.dot(jnp.dot(b1, w2, precision=hi) + b2, w3, precision=hi) + b3  # (O,)

    # Lane-dense y store: pad classifier columns to a multiple of 128, slice after.
    O_pad = _round_up(O, 128)
    if O_pad != O:
        w_cls = jnp.pad(w_cls, ((0, 0), (0, O_pad - O)))
        b_cls = jnp.pad(b_cls, ((0, O_pad - O),))

    bv = bv.reshape(1, H)
    bt = bt.reshape(1, H)
    b_cls = b_cls.reshape(1, O_pad)

    # ---- generation-aware VMEM budget ----
    try:
        vmem_cap = int(pltpu.get_tpu_info().vmem_capacity_bytes)
    except Exception:
        vmem_cap = 64 * 1024 * 1024
    big_vmem = vmem_cap >= 100 * 1024 * 1024            # v5e / v6e (128 MiB); v7x has 64 MiB
    budget = (96 if big_vmem else 40) * 1024 * 1024
    limit_cap = (110 if big_vmem else 48) * 1024 * 1024
    if block_b is None:
        block_b = 1024 if big_vmem else 512

    weights = (wv, bv, wt, bt, wg1, wg2, w_cls, b_cls)
    weight_bytes = sum(int(a.size) * jnp.dtype(a.dtype).itemsize for a in weights)
    in_item = jnp.dtype(x1.dtype).itemsize
    out_dt = jnp.dtype(out_dtype) if out_dtype is not None else jnp.dtype(x1.dtype)
    out_item = out_dt.itemsize

    def tile_bytes(t):  # double-buffered x1/x2 input tiles + y/z output tiles
        return 2 * t * ((Dv + Dt) * in_item + (O_pad + H) * out_item)

    # >= 2 grid steps so both v7x TensorCores get work; rounded to the sublane multiple.
    tb = max(8, min(_round_up(block_b, 8), _round_up(pl.cdiv(B, 2), 8)))
    while tb > 8 and weight_bytes + tile_bytes(tb) > budget:
        tb = _round_up(tb // 2, 8)

    grid = (pl.cdiv(B, tb),)                     # ragged last block, no wrapper pad
    vmem_limit = int(min(max(weight_bytes + tile_bytes(tb) + (8 << 20), 16 << 20), limit_cap))

    y_p, z_p = pl.pallas_call(
        _gated_classifier_kernel,
        out_shape=(jax.ShapeDtypeStruct((B, O_pad), out_dt),
                   jax.ShapeDtypeStruct((B, H), out_dt)),
        grid_spec=pltpu.PrefetchScalarGridSpec(
            num_scalar_prefetch=0,
            grid=grid,
            in_specs=[
                pl.BlockSpec((tb, Dv), lambda i: (i, 0)),    # x1 tile (pipelined)
                pl.BlockSpec((tb, Dt), lambda i: (i, 0)),    # x2 tile (pipelined)
                _resident((Dv, H)),                          # wv  (VMEM-resident, single-buffered)
                _resident((1, H)),                           # bv
                _resident((Dt, H)),                          # wt
                _resident((1, H)),                           # bt
                _resident((H, H)),                           # wg1
                _resident((H, H)),                           # wg2
                _resident((H, O_pad)),                       # w_cls = w1@w2@w3
                _resident((1, O_pad)),                       # b_cls
            ],
            out_specs=[
                pl.BlockSpec((tb, O_pad), lambda i: (i, 0)),  # y_hat tile (lane-dense)
                pl.BlockSpec((tb, H), lambda i: (i, 0)),      # z tile
            ],
        ),
        compiler_params=pltpu.CompilerParams(
            dimension_semantics=("parallel",),   # batch tiles independent -> megacore on v7x
            vmem_limit_bytes=vmem_limit,
        ),
    )(x1, x2, wv, bv, wt, bt, wg1, wg2, w_cls, b_cls)

    y = y_p[:, :O] if O_pad != O else y_p
    return y, z_p


def reference_forward(x1, x2, params, eps=1e-5):
    """Plain-JAX reference of the PyTorch GatedClassifier forward (training-mode BN)."""
    P = jax.lax.Precision.HIGHEST

    def bn(x, gamma, beta):
        mean = jnp.mean(x, axis=0)
        var = jnp.var(x, axis=0)
        return (x - mean) * jax.lax.rsqrt(var + eps) * gamma + beta

    vh = jnp.dot(bn(x1, params["bn_v_gamma"], params["bn_v_beta"]),
                 params["w_vis"], precision=P) + params["b_vis"]
    th = jnp.dot(bn(x2, params["bn_t_gamma"], params["bn_t_beta"]),
                 params["w_text"], precision=P) + params["b_text"]
    x = jnp.concatenate([vh, th], axis=1)
    h = jnp.tanh(x)
    z = jax.nn.sigmoid(jnp.dot(x, params["w_gmu"], precision=P))
    H = params["w_gmu"].shape[1]
    g = z * h[:, :H] + (1.0 - z) * h[:, H:]
    a = jnp.dot(g, params["w1"], precision=P) + params["b1"]
    a = jnp.dot(a, params["w2"], precision=P) + params["b2"]
    a = jnp.dot(a, params["w3"], precision=P) + params["b3"]
    return jax.nn.sigmoid(a), z


if __name__ == "__main__":
    # Small, lane-aligned shapes: B=100 exercises the ragged last batch tile (100 % 32 != 0).
    B, Dv, Dt, H, O = 100, 256, 128, 128, 128

    key = jax.random.PRNGKey(0)
    ks = jax.random.split(key, 13)

    def randn(k, shape, std):
        return jax.random.normal(k, shape, dtype=jnp.float32) * std

    params = {
        # Fresh BatchNorm1d: gamma=1, beta=0 (training-mode batch stats used in forward).
        "bn_v_gamma": jnp.ones((Dv,), jnp.float32),
        "bn_v_beta": jnp.zeros((Dv,), jnp.float32),
        "bn_t_gamma": jnp.ones((Dt,), jnp.float32),
        "bn_t_beta": jnp.zeros((Dt,), jnp.float32),
        "w_vis": randn(ks[0], (Dv, H), (1.0 / Dv) ** 0.5),
        "b_vis": randn(ks[1], (H,), 0.01),
        "w_text": randn(ks[2], (Dt, H), (1.0 / Dt) ** 0.5),
        "b_text": randn(ks[3], (H,), 0.01),
        # kaiming_normal(mode='fan_out') on (2H, H): std = sqrt(2 / (2H)) = sqrt(1/H)
        "w_gmu": randn(ks[4], (2 * H, H), (1.0 / H) ** 0.5),
        "w1": randn(ks[5], (H, H), (1.0 / H) ** 0.5),
        "b1": randn(ks[6], (H,), 0.01),
        "w2": randn(ks[7], (H, H), (1.0 / H) ** 0.5),
        "b2": randn(ks[8], (H,), 0.01),
        "w3": randn(ks[9], (H, O), (1.0 / H) ** 0.5),
        "b3": randn(ks[10], (O,), 0.01),
    }

    x1 = jax.random.normal(ks[11], (B, Dv), dtype=jnp.float32)
    x2 = jax.random.normal(ks[12], (B, Dt), dtype=jnp.float32)

    y_ref, z_ref = reference_forward(x1, x2, params)

    # f32 outputs (default): tight tolerance.
    y_hat, z = gated_classifier_forward(x1, x2, params, block_b=32)
    jax.block_until_ready((y_hat, z))
    assert y_hat.shape == (B, O) and z.shape == (B, H)
    assert jnp.allclose(y_hat, y_ref, atol=2e-3, rtol=2e-3), float(jnp.max(jnp.abs(y_hat - y_ref)))
    assert jnp.allclose(z, z_ref, atol=2e-3, rtol=2e-3), float(jnp.max(jnp.abs(z - z_ref)))

    # bf16 output streams (halves y/z HBM writeback): only output-rounding error added.
    y_bf, z_bf = gated_classifier_forward(x1, x2, params, block_b=32, out_dtype=jnp.bfloat16)
    jax.block_until_ready((y_bf, z_bf))
    assert jnp.allclose(y_bf.astype(jnp.float32), y_ref, atol=6e-3, rtol=1e-2)
    assert jnp.allclose(z_bf.astype(jnp.float32), z_ref, atol=6e-3, rtol=1e-2)

    print("KERNEL_OK")
</pallas_src>

<mosaic_0001>
module attributes {stable_mosaic.version = 11 : i64} {
  func.func @_gated_classifier_kernel(%arg0: i32, %arg1: memref<32x256xf32, #tpu.memory_space<vmem>>, %arg2: memref<32x128xf32, #tpu.memory_space<vmem>>, %arg3: memref<256x128xf32, #tpu.memory_space<vmem>>, %arg4: memref<1x128xf32, #tpu.memory_space<vmem>>, %arg5: memref<128x128xf32, #tpu.memory_space<vmem>>, %arg6: memref<1x128xf32, #tpu.memory_space<vmem>>, %arg7: memref<128x128xf32, #tpu.memory_space<vmem>>, %arg8: memref<128x128xf32, #tpu.memory_space<vmem>>, %arg9: memref<128x128xf32, #tpu.memory_space<vmem>>, %arg10: memref<1x128xf32, #tpu.memory_space<vmem>>, %arg11: memref<32x128xf32, #tpu.memory_space<vmem>>, %arg12: memref<32x128xf32, #tpu.memory_space<vmem>>) attributes {dimension_semantics = [#tpu.dimension_semantics<parallel>], iteration_bounds = array<i64: 4>, scalar_prefetch = 0 : i64, scratch_operands = 0 : i64, tpu.core_type = #tpu.core_type<tc>, window_params = [{transform_indices = @transform_0, window_bounds = array<i64: 32, 256>}, {transform_indices = @transform_1, window_bounds = array<i64: 32, 128>}, {pipeline_mode = #tpu.pipeline_mode<synchronous>, transform_indices = @transform_2, window_bounds = array<i64: 256, 128>}, {pipeline_mode = #tpu.pipeline_mode<synchronous>, transform_indices = @transform_3, window_bounds = array<i64: 1, 128>}, {pipeline_mode = #tpu.pipeline_mode<synchronous>, transform_indices = @transform_4, window_bounds = array<i64: 128, 128>}, {pipeline_mode = #tpu.pipeline_mode<synchronous>, transform_indices = @transform_5, window_bounds = array<i64: 1, 128>}, {pipeline_mode = #tpu.pipeline_mode<synchronous>, transform_indices = @transform_6, window_bounds = array<i64: 128, 128>}, {pipeline_mode = #tpu.pipeline_mode<synchronous>, transform_indices = @transform_7, window_bounds = array<i64: 128, 128>}, {pipeline_mode = #tpu.pipeline_mode<synchronous>, transform_indices = @transform_8, window_bounds = array<i64: 128, 128>}, {pipeline_mode = #tpu.pipeline_mode<synchronous>, transform_indices = @transform_9, window_bounds = array<i64: 1, 128>}, {transform_indices = @transform_10, window_bounds = array<i64: 32, 128>}, {transform_indices = @transform_11, window_bounds = array<i64: 32, 128>}]} {
    %c0 = arith.constant 0 : index
    %c0_0 = arith.constant 0 : index
    %0 = vector.load %arg1[%c0, %c0_0] : memref<32x256xf32, #tpu.memory_space<vmem>>, vector<32x256xf32>
    %c0_1 = arith.constant 0 : index
    %c0_2 = arith.constant 0 : index
    %1 = vector.load %arg3[%c0_1, %c0_2] : memref<256x128xf32, #tpu.memory_space<vmem>>, vector<256x128xf32>
    %cst = arith.constant dense<0.000000e+00> : vector<32x128xf32>
    %2 = tpu.matmul %0, %1, %cst {dimension_numbers = #tpu.dot_dimension_numbers<[1], [0], [0], [1], [0, 0, 1, 1], [], []>} : vector<32x256xf32>, vector<256x128xf32>, vector<32x128xf32> -> vector<32x128xf32>
    %c0_3 = arith.constant 0 : index
    %c0_4 = arith.constant 0 : index
    %3 = vector.load %arg4[%c0_3, %c0_4] : memref<1x128xf32, #tpu.memory_space<vmem>>, vector<1x128xf32>
    %4 = vector.broadcast %3 : vector<1x128xf32> to vector<32x128xf32>
    %5 = arith.addf %2, %4 : vector<32x128xf32>
    %c0_5 = arith.constant 0 : index
    %c0_6 = arith.constant 0 : index
    %6 = vector.load %arg2[%c0_5, %c0_6] : memref<32x128xf32, #tpu.memory_space<vmem>>, vector<32x128xf32>
    %c0_7 = arith.constant 0 : index
    %c0_8 = arith.constant 0 : index
    %7 = vector.load %arg5[%c0_7, %c0_8] : memref<128x128xf32, #tpu.memory_space<vmem>>, vector<128x128xf32>
    %cst_9 = arith.constant dense<0.000000e+00> : vector<32x128xf32>
    %8 = tpu.matmul %6, %7, %cst_9 {dimension_numbers = #tpu.dot_dimension_numbers<[1], [0], [0], [1], [0, 0, 1, 1], [], []>} : vector<32x128xf32>, vector<128x128xf32>, vector<32x128xf32> -> vector<32x128xf32>
    %c0_10 = arith.constant 0 : index
    %c0_11 = arith.constant 0 : index
    %9 = vector.load %arg6[%c0_10, %c0_11] : memref<1x128xf32, #tpu.memory_space<vmem>>, vector<1x128xf32>
    %10 = vector.broadcast %9 : vector<1x128xf32> to vector<32x128xf32>
    %11 = arith.addf %8, %10 : vector<32x128xf32>
    %c0_12 = arith.constant 0 : index
    %c0_13 = arith.constant 0 : index
    %12 = vector.load %arg7[%c0_12, %c0_13] : memref<128x128xf32, #tpu.memory_space<vmem>>, vector<128x128xf32>
    %cst_14 = arith.constant dense<0.000000e+00> : vector<32x128xf32>
    %13 = tpu.matmul %5, %12, %cst_14 {dimension_numbers = #tpu.dot_dimension_numbers<[1], [0], [0], [1], [0, 0, 1, 1], [], []>} : vector<32x128xf32>, vector<128x128xf32>, vector<32x128xf32> -> vector<32x128xf32>
    %c0_15 = arith.constant 0 : index
    %c0_16 = arith.constant 0 : index
    %14 = vector.load %arg8[%c0_15, %c0_16] : memref<128x128xf32, #tpu.memory_space<vmem>>, vector<128x128xf32>
    %cst_17 = arith.constant dense<0.000000e+00> : vector<32x128xf32>
    %15 = tpu.matmul %11, %14, %cst_17 {dimension_numbers = #tpu.dot_dimension_numbers<[1], [0], [0], [1], [0, 0, 1, 1], [], []>} : vector<32x128xf32>, vector<128x128xf32>, vector<32x128xf32> -> vector<32x128xf32>
    %16 = arith.addf %13, %15 : vector<32x128xf32>
    %17 = arith.negf %16 : vector<32x128xf32>
    %18 = math.exp %17 : vector<32x128xf32>
    %cst_18 = arith.constant 1.000000e+00 : f32
    %19 = vector.broadcast %cst_18 : f32 to vector<32x128xf32>
    %20 = arith.addf %19, %18 : vector<32x128xf32>
    %21 = arith.divf %19, %20 : vector<32x128xf32>
    %22 = math.tanh %11 : vector<32x128xf32>
    %23 = math.tanh %5 : vector<32x128xf32>
    %24 = arith.subf %23, %22 : vector<32x128xf32>
    %25 = arith.mulf %21, %24 : vector<32x128xf32>
    %26 = arith.addf %22, %25 : vector<32x128xf32>
    %c0_19 = arith.constant 0 : index
    %c0_20 = arith.constant 0 : index
    %27 = vector.load %arg9[%c0_19, %c0_20] : memref<128x128xf32, #tpu.memory_space<vmem>>, vector<128x128xf32>
    %cst_21 = arith.constant dense<0.000000e+00> : vector<32x128xf32>
    %28 = tpu.matmul %26, %27, %cst_21 {dimension_numbers = #tpu.dot_dimension_numbers<[1], [0], [0], [1], [0, 0, 1, 1], [], []>} : vector<32x128xf32>, vector<128x128xf32>, vector<32x128xf32> -> vector<32x128xf32>
    %c0_22 = arith.constant 0 : index
    %c0_23 = arith.constant 0 : index
    %29 = vector.load %arg10[%c0_22, %c0_23] : memref<1x128xf32, #tpu.memory_space<vmem>>, vector<1x128xf32>
    %30 = vector.broadcast %29 : vector<1x128xf32> to vector<32x128xf32>
    %31 = arith.addf %28, %30 : vector<32x128xf32>
    %32 = arith.negf %31 : vector<32x128xf32>
    %33 = math.exp %32 : vector<32x128xf32>
    %cst_24 = arith.constant 1.000000e+00 : f32
    %34 = vector.broadcast %cst_24 : f32 to vector<32x128xf32>
    %35 = arith.addf %34, %33 : vector<32x128xf32>
    %36 = arith.divf %34, %35 : vector<32x128xf32>
    %c0_25 = arith.constant 0 : index
    %c0_26 = arith.constant 0 : index
    %37 = vector.load %arg11[%c0_25, %c0_26] : memref<32x128xf32, #tpu.memory_space<vmem>>, vector<32x128xf32>
    tpu.vector_store %arg11[%c0_25, %c0_26], %36 {strides = array<i32>} : memref<32x128xf32, #tpu.memory_space<vmem>>, vector<32x128xf32>,
    %c0_27 = arith.constant 0 : index
    %c0_28 = arith.constant 0 : index
    %38 = vector.load %arg12[%c0_27, %c0_28] : memref<32x128xf32, #tpu.memory_space<vmem>>, vector<32x128xf32>
    tpu.vector_store %arg12[%c0_27, %c0_28], %21 {strides = array<i32>} : memref<32x128xf32, #tpu.memory_space<vmem>>, vector<32x128xf32>,
    return
  }
  func.func @transform_0(%arg0: i32) -> (i32, i32) {
    %c0_i32 = arith.constant 0 : i32
    %c0_i32_0 = arith.constant 0 : i32
    return %arg0, %c0_i32 : i32, i32
  }
  func.func @transform_1(%arg0: i32) -> (i32, i32) {
    %c0_i32 = arith.constant 0 : i32
    %c0_i32_0 = arith.constant 0 : i32
    return %arg0, %c0_i32 : i32, i32
  }
  func.func @transform_2(%arg0: i32) -> (i32, i32) {
    %c0_i32 = arith.constant 0 : i32
    %c0_i32_0 = arith.constant 0 : i32
    %c0_i32_1 = arith.constant 0 : i32
    return %c0_i32, %c0_i32_0 : i32, i32
  }
  func.func @transform_3(%arg0: i32) -> (i32, i32) {
    %c0_i32 = arith.constant 0 : i32
    %c0_i32_0 = arith.constant 0 : i32
    %c0_i32_1 = arith.constant 0 : i32
    return %c0_i32, %c0_i32_0 : i32, i32
  }
  func.func @transform_4(%arg0: i32) -> (i32, i32) {
    %c0_i32 = arith.constant 0 : i32
    %c0_i32_0 = arith.constant 0 : i32
    %c0_i32_1 = arith.constant 0 : i32
    return %c0_i32, %c0_i32_0 : i32, i32
  }
  func.func @transform_5(%arg0: i32) -> (i32, i32) {
    %c0_i32 = arith.constant 0 : i32
    %c0_i32_0 = arith.constant 0 : i32
    %c0_i32_1 = arith.constant 0 : i32
    return %c0_i32, %c0_i32_0 : i32, i32
  }
  func.func @transform_6(%arg0: i32) -> (i32, i32) {
    %c0_i32 = arith.constant 0 : i32
    %c0_i32_0 = arith.constant 0 : i32
    %c0_i32_1 = arith.constant 0 : i32
    return %c0_i32, %c0_i32_0 : i32, i32
  }
  func.func @transform_7(%arg0: i32) -> (i32, i32) {
    %c0_i32 = arith.constant 0 : i32
    %c0_i32_0 = arith.constant 0 : i32
    %c0_i32_1 = arith.constant 0 : i32
    return %c0_i32, %c0_i32_0 : i32, i32
  }
  func.func @transform_8(%arg0: i32) -> (i32, i32) {
    %c0_i32 = arith.constant 0 : i32
    %c0_i32_0 = arith.constant 0 : i32
    %c0_i32_1 = arith.constant 0 : i32
    return %c0_i32, %c0_i32_0 : i32, i32
  }
  func.func @transform_9(%arg0: i32) -> (i32, i32) {
    %c0_i32 = arith.constant 0 : i32
    %c0_i32_0 = arith.constant 0 : i32
    %c0_i32_1 = arith.constant 0 : i32
    return %c0_i32, %c0_i32_0 : i32, i32
  }
  func.func @transform_10(%arg0: i32) -> (i32, i32) {
    %c0_i32 = arith.constant 0 : i32
    %c0_i32_0 = arith.constant 0 : i32
    return %arg0, %c0_i32 : i32, i32
  }
  func.func @transform_11(%arg0: i32) -> (i32, i32) {
    %c0_i32 = arith.constant 0 : i32
    %c0_i32_0 = arith.constant 0 : i32
    return %arg0, %c0_i32 : i32, i32
  }
}

</mosaic_0001>

<bundles_post_ra>
// kernel: tpu_custom_call.1
= control target key start
LH: loop header
LB: loop body
LE: loop exit
PB: predicated region body
PF: predicated region fallthrough
CT: control target
= control target key end

     0   :  { %s2957_s0 = inlined_call_operand.hbm [shape: f32[100,256], index: 0, kind: input, shape index: {}]   ;;  %s2958_s1 = inlined_call_operand.hbm [shape: f32[100,128], index: 1, kind: input, shape index: {}]   ;;  %s2959_s2 = inlined_call_operand.hbm [shape: f32[256,128], index: 2, kind: input, shape index: {}]   ;;  %s2960_s3 = inlined_call_operand.vmem [shape: f32[1,128], index: 3, kind: input, shape index: {}]   ;;  %s2961_s4 = inlined_call_operand.hbm [shape: f32[128,128], index: 4, kind: input, shape index: {}]   ;;  %s2962_s5 = inlined_call_operand.vmem [shape: f32[1,128], index: 5, kind: input, shape index: {}]   ;;  %s2963_s6 = inlined_call_operand.hbm [shape: f32[128,128], index: 6, kind: input, shape index: {}]   ;;  %s2964_s7 = inlined_call_operand.hbm [shape: f32[128,128], index: 7, kind: input, shape index: {}]   ;;  %s2965_s8 = inlined_call_operand.hbm [shape: f32[128,128], index: 8, kind: input, shape index: {}]   ;;  %s2966_s9 = inlined_call_operand.vmem [shape: f32[1,128], index: 9, kind: input, shape index: {}]   ;;  %s2967_s10 = inlined_call_operand.hbm [shape: f32[100,128], index: 10, kind: output, shape index: {0}]   ;;  %s2968_s11 = inlined_call_operand.hbm [shape: f32[100,128], index: 11, kind: output, shape index: {1}]  }
   0x1   :  { %2979 = sst [smem:[#allocation29_spill]] %s2960_s3 }
   0x2   :  { %2980 = sst [smem:[#allocation30_spill]] %s2961_s4 }
   0x3   :  { %2981 = sst [smem:[#allocation31_spill]] %s2966_s9 }
   0x4   :  { %2982 = sst [smem:[#allocation32_spill]] %s2967_s10 }
   0x5   :  { %2983 = sst [smem:[#allocation33_spill]] %s2968_s11 }
   0x6   :  { %17 = vsyncpa [#allocation3], 0 }
   0x7   :  { %19 = vsyncpa [#allocation3 + $0x1], 0 }
   0x8   :  { %20 = vsyncpa [#allocation6], 0 }
   0x9   :  { %22 = vsyncpa [#allocation6 + $0x1], 0 }
   0xa   :  { %23 = vsyncpa [#allocation9], 0 }
   0xb   :  { %24 = vsyncpa [#allocation12], 0 }
   0xc   :  { %25 = vsyncpa [#allocation4], 0 }
   0xd   :  { %27 = vsyncpa [#allocation4 + $0x1], 0 }
   0xe   :  { %28 = vsyncpa [#allocation16], 0 }
   0xf   :  { %30 = vsyncpa [#allocation16 + $0x1], 0  ;;  %s2466_s17 = smov 0   ;;  %s2468_s18 = smov 0  }
  0x10   :  { %s2470_s19 = smov 0   ;;  %s2472_s20 = smov 0  }
  0x11 LB: > { %2984 = sst [smem:[#allocation24_spill]] %s2373_s17  ;;  %s2487_s21 = sadd.s32 4294967295, %s2385_s20   ;;  %s2385_s20 = sphi %s2472_s20, %s3018_s20   ;;  %s2381_s19 = sphi %s2470_s19, %s3022_s19   ;;  %s2377_s18 = sphi %s2468_s18, %s3021_s18   ;;  %s2373_s17 = sphi %s2466_s17, %s3020_s17  }
  0x12   : > { %s1415_s22 = sadd.s32 4294967294, %s2385_s20   ;;  %s2491_s23 = sadd.s32 1, %s2385_s20  }
  0x13   : > { %2985 = sst [smem:[#allocation25_spill]] %s2491_s23  ;;  %s43_s24 = sadd.s32 1, %s2381_s19 }
  0x14   : > { %s40_s25 = ssub.s32 %s2385_s20, %s2491_s23  ;;  %p50_p0 = scmp.ne.s32.totalorder %s2381_s19, %s2377_s18 }
  0x15   : > { %p41_p1 = scmp.eq.s32.totalorder %s40_s25, 0  ;;  %p51_p2 = scmp.eq.s32.totalorder %s2385_s20, 0 }
  0x16   : > { %p56_p3 = scmp.ne.s32.totalorder %s2377_s18, %s2373_s17  ;;  %p2973_p4 = scmp.eq.s32.totalorder %s2487_s21, 0 }
  0x17   : > { %s2503_s26 = scalar_select %p41_p1, %s2381_s19, %s43_s24  }
  0x18   : > { %p2505_p5 = por %p51_p2, %p50_p0  ;;  %p2511_p6 = por %p2973_p4, %p56_p3 }
  0x19   : > { %2986 = sst [smem:[#allocation26_spill]] %s2503_s26  ;;  %p274_p7 = scmp.eq.s32.totalorder %s2487_s21, 3 }
  0x1a   : > { %s2987_s27 = scalar_select %p2505_p5, 1, 0 }
  0x1b   : > { %s2988_s28 = scalar_select %p2511_p6, 1, 0 }
  0x1c   : > { %p280_p8 = scmp.eq.s32.totalorder %s1415_s22, 3  ;;  %p1416_p9 = scmp.ge.s32.totalorder %s2385_s20, 1 }
  0x1d   : > { %p313_p10 = scmp.lt.s32.totalorder %s2385_s20, 5  ;;  %p2518_p11 = por %p274_p7, %p50_p0 }
  0x1e   : > { %p2522_p12 = por %p280_p8, %p56_p3  ;;  %s2387_s13 = smov [#allocation8]  }
  0x1f   : > { %s2989_s29 = scalar_select %p2518_p11, 1, 0 }
  0x20   : > { %s2991_s30 = scalar_select %p2522_p12, 1, 0 }
  0x21   : > { %2990 = sst [smem:[#allocation27_spill]] %s2989_s29  ;;  %p2526_p13 = pnand %p1416_p9, %p313_p10 }
  0x22   : > { %2992 = sst [smem:[#allocation28_spill]] %s2991_s30  ;;  %s341_s14 = sshll.u32 %s2387_s13, 4  ;;  %s342_s14 = int_to_ptr.vmem [resolvable:$true] %s341_s14 }
  0x23   : > { %s2993_s12 = scalar_select %p2526_p13, 1, 0 }
  0x24   : > { %p1946_p1 = pneg %p2526_p13  ;;  %s2388_s16 = smov [#allocation11]  }
  0x25   : > { %s370_s22 = sshll.u32 %s2388_s16, 4  ;;  %s2995_s4 = sld [smem:[#allocation30_spill]]  ;;  %s2538_s22 = int_to_ptr.vmem [resolvable:$true] %s370_s22 }
  0x26   : > { %p2534_p2 = pnand %p1946_p1, %p2973_p4 }
  0x28   : > { %p2548_p3 = pneg %p2534_p2 }
  0x2b   : > { %s2075_s26 = scalar_lea.hbm %s2995_s4, 2048 }
  0x2c   : > { %p2076_p0 = scmp.ne.s32.totalorder %s2995_s4, %s2075_s26  ;;  %p2082_p9 = scmp.lt.u32.totalorder %s2075_s26, %s2995_s4 }
  0x2e   : > { %p2078_p7 = pnand %p2548_p3, %p2076_p0 }
  0x30   : > { %p2079_p8 = pneg %p2078_p7 }
  0x32   : > { %p2084_p10 = pnand %p2082_p9, %p2079_p8 }
  0x34   : > { %2087 = shalt.err (!%p2084_p10)
}
  0x35   : > { %s2088_s24 = scalar_lea.vmem %s342_s14, 2048  ;;  %p2096_p11 = scmp.lt.s32.totalorder %s342_s14, %s342_s14 }
  0x36   : > { %p2089_p1 = scmp.ne.s32.totalorder %s342_s14, %s2088_s24  ;;  %p2097_p6 = scmp.lt.s32.totalorder %s2088_s24, %s2088_s24 }
  0x38   : > { %p2091_p4 = pnand %p2089_p1, %p2548_p3  ;;  %p2098_p13 = por %p2097_p6, %p2096_p11 }
  0x3a   : > { %p2092_p12 = pneg %p2091_p4 }
  0x3c   : > { %p2099_p5 = pnand %p2098_p13, %p2092_p12 }
  0x3e   : > { %2102 = shalt.err (!%p2099_p5)
}
  0x3f   : > { %s2389_s23 = smov 128   ;;  %s2390_s30 = smov 8  }
  0x40   : > { %1952 = dma.hbm_to_vmem [thread:$0]  (!%p2534_p2), %s2995_s4, 2048, %s342_s14, [#allocation9], %s2389_s23, %s2389_s23, %s2390_s30  }
  0x41   : > { %s2103_s11 = scalar_lea.hbm %s2964_s7, 2048 }
  0x42   : > { %p2104_p4 = scmp.ne.s32.totalorder %s2964_s7, %s2103_s11  ;;  %p2110_p11 = scmp.lt.u32.totalorder %s2103_s11, %s2964_s7 }
  0x44   : > { %p2106_p5 = pnand %p2104_p4, %p2548_p3 }
  0x46   : > { %p2107_p6 = pneg %p2106_p5 }
  0x48   : > { %p2112_p12 = pnand %p2110_p11, %p2107_p6 }
  0x4a   : > { %2115 = shalt.err (!%p2112_p12)
}
  0x4b   : > { %s2116_s14 = scalar_lea.vmem %s2538_s22, 2048  ;;  %p2124_p8 = scmp.lt.s32.totalorder %s2538_s22, %s2538_s22 }
  0x4c   : > { %p2117_p13 = scmp.ne.s32.totalorder %s2538_s22, %s2116_s14  ;;  %p2125_p9 = scmp.lt.s32.totalorder %s2116_s14, %s2116_s14 }
  0x4e   : > { %p2119_p0 = pnand %p2117_p13, %p2548_p3  ;;  %p2126_p10 = por %p2125_p9, %p2124_p8 }
  0x50   : > { %p2120_p7 = pneg %p2119_p0 }
  0x52   : > { %p2127_p1 = pnand %p2126_p10, %p2120_p7 }
  0x54   : > { %2130 = shalt.err (!%p2127_p1)
}
  0x55   : > { %1958 = dma.hbm_to_vmem [thread:$0]  (!%p2534_p2), %s2964_s7, 2048, %s2538_s22, [#allocation12], %s2389_s23, %s2389_s23, %s2390_s30  }
  0x56   : > { %s2391_s11 = smov [#allocation7]   ;;  %s2392_s17 = smov [#allocation10]  }
  0x57   : > { %s325_s29 = sshll.u32 %s2391_s11, 4  ;;  %s357_s26 = sshll.u32 %s2392_s17, 4  ;;  %s326_s29 = int_to_ptr.vmem [resolvable:$true] %s325_s29  ;;  %s358_s26 = int_to_ptr.vmem [resolvable:$true] %s357_s26 }
  0x58   : > { %s2131_s24 = scalar_lea.hbm %s2959_s2, 4096 }
  0x59   : > { %p2132_p4 = scmp.ne.s32.totalorder %s2959_s2, %s2131_s24  ;;  %p2138_p11 = scmp.lt.u32.totalorder %s2131_s24, %s2959_s2 }
  0x5b   : > { %p2134_p5 = pnand %p2132_p4, %p2548_p3 }
  0x5d   : > { %p2135_p6 = pneg %p2134_p5 }
  0x5f   : > { %p2140_p12 = pnand %p2138_p11, %p2135_p6 }
  0x61   : > { %2143 = shalt.err (!%p2140_p12)
}
  0x62   : > { %s2144_s22 = scalar_lea.vmem %s326_s29, 4096  ;;  %p2152_p8 = scmp.lt.s32.totalorder %s326_s29, %s326_s29 }
  0x63   : > { %p2145_p13 = scmp.ne.s32.totalorder %s326_s29, %s2144_s22  ;;  %p2153_p9 = scmp.lt.s32.totalorder %s2144_s22, %s2144_s22 }
  0x65   : > { %p2147_p0 = pnand %p2145_p13, %p2548_p3  ;;  %p2154_p10 = por %p2153_p9, %p2152_p8 }
  0x67   : > { %p2148_p7 = pneg %p2147_p0 }
  0x69   : > { %p2155_p1 = pnand %p2154_p10, %p2148_p7 }
  0x6b   : > { %2158 = shalt.err (!%p2155_p1)
}
  0x6c   : > { %1949 = dma.hbm_to_vmem [thread:$0]  (!%p2534_p2), %s2959_s2, 4096, %s326_s29, [#allocation6], %s2389_s23, %s2389_s23, %s2390_s30  }
  0x6d   : > { %s2159_s17 = scalar_lea.hbm %s2963_s6, 2048 }
  0x6e   : > { %p2160_p4 = scmp.ne.s32.totalorder %s2963_s6, %s2159_s17  ;;  %p2166_p11 = scmp.lt.u32.totalorder %s2159_s17, %s2963_s6 }
  0x70   : > { %p2162_p5 = pnand %p2160_p4, %p2548_p3 }
  0x72   : > { %p2163_p6 = pneg %p2162_p5 }
  0x74   : > { %p2168_p12 = pnand %p2166_p11, %p2163_p6 }
  0x76   : > { %2171 = shalt.err (!%p2168_p12)
}
  0x77   : > { %s2172_s9 = scalar_lea.vmem %s358_s26, 2048  ;;  %p2180_p8 = scmp.lt.s32.totalorder %s358_s26, %s358_s26 }
  0x78   : > { %p2173_p13 = scmp.ne.s32.totalorder %s358_s26, %s2172_s9  ;;  %p2181_p9 = scmp.lt.s32.totalorder %s2172_s9, %s2172_s9 }
  0x7a   : > { %p2175_p0 = pnand %p2173_p13, %p2548_p3  ;;  %p2182_p10 = por %p2181_p9, %p2180_p8 }
  0x7c   : > { %p2176_p7 = pneg %p2175_p0 }
  0x7e   : > { %p2183_p1 = pnand %p2182_p10, %p2176_p7 }
  0x80   : > { %2186 = shalt.err (!%p2183_p1)
}
  0x81   : > { %1955 = dma.hbm_to_vmem [thread:$0]  (!%p2534_p2), %s2963_s6, 2048, %s358_s26, [#allocation9], %s2389_s23, %s2389_s23, %s2390_s30  }
  0x82   : > { %s2393_s3 = smov [#allocation13]   ;;  %s2187_s17 = scalar_lea.hbm %s2965_s8, 2048 }
  0x83   : > { %s383_s4 = sshll.u32 %s2393_s3, 4  ;;  %p2188_p4 = scmp.ne.s32.totalorder %s2965_s8, %s2187_s17  ;;  %s384_s4 = int_to_ptr.vmem [resolvable:$true] %s383_s4 }
  0x84   : > { %p2194_p11 = scmp.lt.u32.totalorder %s2187_s17, %s2965_s8 }
  0x85   : > { %p2190_p5 = pnand %p2188_p4, %p2548_p3 }
  0x87   : > { %p2191_p6 = pneg %p2190_p5 }
  0x89   : > { %p2196_p12 = pnand %p2194_p11, %p2191_p6 }
  0x8b   : > { %2199 = shalt.err (!%p2196_p12)
}
  0x8c   : > { %s2200_s26 = scalar_lea.vmem %s384_s4, 2048  ;;  %p2208_p8 = scmp.lt.s32.totalorder %s384_s4, %s384_s4 }
  0x8d   : > { %p2201_p13 = scmp.ne.s32.totalorder %s384_s4, %s2200_s26  ;;  %p2209_p9 = scmp.lt.s32.totalorder %s2200_s26, %s2200_s26 }
  0x8f   : > { %p2203_p0 = pnand %p2201_p13, %p2548_p3  ;;  %p2210_p10 = por %p2209_p9, %p2208_p8 }
  0x91   : > { %p2204_p7 = pneg %p2203_p0 }
  0x93   : > { %p2211_p1 = pnand %p2210_p10, %p2204_p7 }
  0x95   : > { %2214 = shalt.err (!%p2211_p1)
}
  0x96   : > { %1961 = dma.hbm_to_vmem [thread:$0]  (!%p2534_p2), %s2965_s8, 2048, %s384_s4, [#allocation12], %s2389_s23, %s2389_s23, %s2390_s30  }
  0x97   : > { %p1422_p4 = scmp.ge.s32.totalorder %s2385_s20, 4 }
  0x98   : > { %p2997_p3 = scmp.ne.s32.totalorder (!%p1422_p4), %s2987_s27, 0 }
  0x99   : > { %396 = sbr.rel (%p1422_p4) target bundleno = 232 (0xe8), region = 48 }
  0xa0   : > { %399 = sbr.rel (!%p2997_p3) target bundleno = 195 (0xc3), region = 52  ;;  %s400_s13 = sand.u32 (%p2997_p3), 1, %s2381_s19  }
  0xa1   : > { %s1424_s22 = sshll.u32 (%p2997_p3), %s2385_s20, 2  ;;  %s1423_s3 = sshll.u32 (%p2997_p3), %s400_s13, 6 }
  0xa2   : > { %s406_s10 = ssub.s32 (%p2997_p3), 13, %s1424_s22  ;;  %s2664_s17 = scalar_lea.sflag (%p2997_p3), [#allocation3], %s400_s13 }
  0xa3   : > { %p407_p5 = scmp.lt.s32.totalorder (%p2997_p3), %s406_s10, 4  ;;  %s404_s23 = scalar_lea.vmem (%p2997_p3), [#allocation2], %s1423_s3 }
  0xa7   : > { %s3024_s10 = smov (!%p407_p5, %s406_s10), 4 }
  0xa8   : > { %s2661_s15 = sshll.u32 %s3024_s10, 8 }
  0xa9   : > { %s412_s11 = ssub.s32 1024, %s2661_s15 }
  0xaa   : > { %413 = vsyncadd %s2664_s17, %s412_s11  ;;  %p1427_p2 = scmp.ne.s32.totalorder %s2661_s15, 0  ;;  %s1478_s30 = sshll.u32 %s2385_s20, 10 }
  0xab   : > { %s2672_s16 = scalar_lea.hbm %s2957_s0, %s1478_s30  ;;  %s419_s24 = sshll.u32 %s404_s23, 4  ;;  %s2674_s24 = int_to_ptr.vmem [resolvable:$true] %s419_s24 }
  0xac   : > { %s2215_s14 = scalar_lea.hbm %s2672_s16, %s2661_s15  ;;  %s2219_s29 = scalar_lea.hbm %s2957_s0, 3328 }
  0xad   : > { %p2216_p6 = scmp.ne.s32.totalorder %s2672_s16, %s2215_s14  ;;  %p2220_p13 = scmp.lt.u32.totalorder %s2672_s16, %s2957_s0 }
  0xae   : > { %p2221_p0 = scmp.lt.u32.totalorder %s2219_s29, %s2215_s14  ;;  %p2223_p8 = scmp.lt.u32.totalorder %s2215_s14, %s2672_s16 }
  0xaf   : > { %p2217_p11 = pnand %p2216_p6, %p1427_p2 }
  0xb0   : > { %p2222_p7 = por %p2221_p0, %p2220_p13 }
  0xb1   : > { %p2218_p12 = pneg %p2217_p11 }
  0xb2   : > { %p2224_p9 = por %p2223_p8, %p2222_p7 }
  0xb4   : > { %p2225_p10 = pnand %p2224_p9, %p2218_p12 }
  0xb6   : > { %2228 = shalt.err (!%p2225_p10)
}
  0xb7   : > { %s2229_s3 = scalar_lea.vmem %s2674_s24, %s2661_s15  ;;  %s2394_s10 = smov [#allocation2]  }
  0xb8   : > { %p2230_p1 = scmp.ne.s32.totalorder %s2674_s24, %s2229_s3  ;;  %s2233_s11 = sshll.u32 %s2394_s10, 4  ;;  %s2234_s11 = int_to_ptr.vmem [resolvable:$false] %s2233_s11 }
  0xb9   : > { %s2235_s23 = scalar_lea.vmem %s2234_s11, 2048  ;;  %p2236_p5 = scmp.lt.s32.totalorder %s2674_s24, %s2234_s11 }
  0xba   : > { %p2231_p4 = pnand %p2230_p1, %p1427_p2  ;;  %p2237_p6 = scmp.lt.s32.totalorder %s2235_s23, %s2229_s3 }
  0xbc   : > { %p2232_p3 = pneg %p2231_p4  ;;  %p2238_p11 = por %p2237_p6, %p2236_p5 }
  0xbe   : > { %p2239_p13 = pnand %p2238_p11, %p2232_p3 }
  0xc0   : > { %2242 = shalt.err (!%p2239_p13)
}
  0xc1   : > { %s2395_s30 = smov 256   ;;  %s2396_s4 = smov 16  }
  0xc2   : > { %425 = dma.hbm_to_vmem [thread:$0]  (%p1427_p2), %s2672_s16, %s2661_s15, %s2674_s24, %s2664_s17, %s2395_s30, %s2395_s30, %s2396_s4  }
  0xc3 PF: > { %p2998_p12 = scmp.ne.s32.totalorder %s2987_s27, 0 }
  0xc4   : > { %s429_s25 = sand.u32 (%p2998_p12), 1, %s2385_s20   ;;  %s431_s14 = sand.u32 (%p2998_p12), 1, %s2381_s19  }
  0xc5   : > { %428 = sbr.rel (!%p2998_p12) target bundleno = 232 (0xe8), region = 56  ;;  %s1432_s26 = sshll.u32 (%p2998_p12), %s431_s14, 5 }
  0xc6   : > { %s1433_s9 = sshll.u32 (%p2998_p12), %s2385_s20, 2  ;;  %s2709_s3 = scalar_lea.sflag (%p2998_p12), [#allocation6], %s429_s25 }
  0xc7   : > { %s435_s29 = ssub.s32 (%p2998_p12), 13, %s1433_s9  ;;  %s433_s15 = scalar_lea.vmem (%p2998_p12), [#allocation5], %s1432_s26 }
  0xc8   : > { %p436_p0 = scmp.lt.s32.totalorder (%p2998_p12), %s435_s29, 4 }
  0xcc   : > { %s3026_s29 = smov (!%p436_p0, %s435_s29), 4 }
  0xcd   : > { %s2706_s13 = sshll.u32 %s3026_s29, 7 }
  0xce   : > { %s440_s22 = ssub.s32 512, %s2706_s13 }
  0xcf   : > { %441 = vsyncadd %s2709_s3, %s440_s22  ;;  %p1435_p2 = scmp.ne.s32.totalorder %s2706_s13, 0  ;;  %s1479_s27 = sshll.u32 %s2385_s20, 9 }
  0xd0   : > { %s2717_s24 = scalar_lea.hbm %s2958_s1, %s1479_s27  ;;  %s446_s10 = sshll.u32 %s433_s15, 4  ;;  %s2719_s10 = int_to_ptr.vmem [resolvable:$true] %s446_s10 }
  0xd1   : > { %s2243_s11 = scalar_lea.hbm %s2717_s24, %s2706_s13  ;;  %s2247_s4 = scalar_lea.hbm %s2958_s1, 1664 }
  0xd2   : > { %p2244_p7 = scmp.ne.s32.totalorder %s2717_s24, %s2243_s11  ;;  %p2248_p10 = scmp.lt.u32.totalorder %s2717_s24, %s2958_s1 }
  0xd3   : > { %p2249_p1 = scmp.lt.u32.totalorder %s2247_s4, %s2243_s11  ;;  %p2251_p3 = scmp.lt.u32.totalorder %s2243_s11, %s2717_s24 }
  0xd4   : > { %p2245_p8 = pnand %p2244_p7, %p1435_p2 }
  0xd5   : > { %p2250_p4 = por %p2249_p1, %p2248_p10 }
  0xd6   : > { %p2246_p9 = pneg %p2245_p8 }
  0xd7   : > { %p2252_p5 = por %p2251_p3, %p2250_p4 }
  0xd9   : > { %p2253_p6 = pnand %p2252_p5, %p2246_p9 }
  0xdb   : > { %2256 = shalt.err (!%p2253_p6)
}
  0xdc   : > { %s2257_s26 = scalar_lea.vmem %s2719_s10, %s2706_s13  ;;  %s2397_s9 = smov [#allocation5]  }
  0xdd   : > { %p2258_p11 = scmp.ne.s32.totalorder %s2719_s10, %s2257_s26  ;;  %s2261_s29 = sshll.u32 %s2397_s9, 4  ;;  %s2262_s29 = int_to_ptr.vmem [resolvable:$false] %s2261_s29 }
  0xde   : > { %s2263_s22 = scalar_lea.vmem %s2262_s29, 1024  ;;  %p2264_p0 = scmp.lt.s32.totalorder %s2719_s10, %s2262_s29 }
  0xdf   : > { %p2259_p13 = pnand %p2258_p11, %p1435_p2  ;;  %p2265_p7 = scmp.lt.s32.totalorder %s2263_s22, %s2257_s26 }
  0xe1   : > { %p2260_p12 = pneg %p2259_p13  ;;  %p2266_p8 = por %p2265_p7, %p2264_p0 }
  0xe3   : > { %p2267_p10 = pnand %p2266_p8, %p2260_p12 }
  0xe5   : > { %2270 = shalt.err (!%p2267_p10)
}
  0xe6   : > { %s2398_s15 = smov 128   ;;  %s2399_s27 = smov 8  }
  0xe7   : > { %452 = dma.hbm_to_vmem [thread:$0]  (%p1435_p2), %s2717_s24, %s2706_s13, %s2719_s10, %s2709_s3, %s2398_s15, %s2398_s15, %s2399_s27  }
  0xe8 PF: > { %p2999_p9 = scmp.ne.s32.totalorder %s2993_s12, 0 }
  0xe9   : > { %s2749_s17 = sand.u32 (!%p2999_p9), 1, %s2377_s18   ;;  %p3000_p1 = scmp.ne.s32.totalorder (!%p2999_p9), %s2988_s28, 0 }
  0xea   : > { %458 = sbr.rel (%p2999_p9) target bundleno = 1101 (0x44d), region = 60  ;;  %s1440_s16 = sshll.u32 (!%p2999_p9), %s2749_s17, 6 }
  0xeb   : > { %s461_s11 = scalar_lea.sflag (!%p2999_p9), [#allocation3], %s2749_s17  ;;  %s2753_s23 = scalar_lea.vmem (!%p2999_p9), [#allocation2], %s1440_s16 }
  0xf1   : > { %2344 = dma.done.wait (%p3000_p1), %s461_s11, 1024  }
  0xf2   : > { %2346 = vsyncadd (%p3000_p1), %s461_s11, 4294966272  ;;  %s469_s12 = sand.u32 1, %s2487_s21   ;;  %s2761_s13 = sshll.u32 %s2749_s17, 5 }
  0xf3   : > { %s470_s3 = scalar_lea.sflag [#allocation6], %s469_s12  ;;  %s2764_s24 = scalar_lea.vmem [#allocation5], %s2761_s13 }
  0xf4   : > { %2348 = dma.done.wait (%p3000_p1), %s470_s3, 512  }
  0xf5   : > { %2350 = vsyncadd (%p3000_p1), %s470_s3, 4294966784  ;;  %p3001_p2 = scmp.eq.s32.totalorder %s2487_s21, 0 }
  0xf7   : > { %2352 = dma.done.wait (%p3001_p2), [#allocation6], 4096   ;;  %p3002_p4 = pmov %p3001_p2 }
  0xf8   : > { %p3003_p3 = pmov %p3001_p2 }
  0xf9   : > { %2354 = vsyncadd (%p3002_p4), [#allocation6], 4294963200 }
  0xfa   : > { %2356 = dma.done.wait (%p3003_p3), [#allocation9], 4096   ;;  %p3004_p5 = pmov %p3001_p2 }
  0xfb   : > { %p3005_p6 = pmov %p3001_p2 }
  0xfc   : > { %2358 = vsyncadd (%p3004_p5), [#allocation9], 4294963200 }
  0xfd   : > { %2360 = dma.done.wait (%p3005_p6), [#allocation12], 4096   ;;  %p3006_p11 = pmov %p3001_p2 }
  0xfe   : > { %v587_v0 = vld [vmem:[#allocation7 + $0x80] sm:$0xff]  ;;  %v588_v1 = vld [vmem:[#allocation7 + $0x88] sm:$0xff]  ;;  %v589_v9 = vld [vmem:[#allocation7 + $0x90] sm:$0xff]  ;;  %s3007_s25 = sld [smem:[#allocation29_spill]]  ;;  %s2825_s14 = scalar_lea.vmem [#allocation15], %s2761_s13 }
  0xff   : > { %2362 = vsyncadd (%p3006_p11), [#allocation12], 4294963200  ;;  %v699_v2 = vld [vmem:[#allocation8] sm:$0xff]  ;;  %v1758_v3 = vpack.c.bf16 %v588_v1, %v587_v0  ;;  %v700_v4 = vld [vmem:[#allocation8 + $0x8] sm:$0xff]  ;;  %s3008_s29 = sld [smem:[#allocation31_spill]]  ;;  %s534_s22 = scalar_lea.vmem [#allocation14], %s2761_s13 }
 0x100   : > { %v571_v5 = vld [vmem:[#allocation7] sm:$0xff]  ;;  %v572_v6 = vld [vmem:[#allocation7 + $0x8] sm:$0xff]  ;;  %v1790_v7 = vpack.c.bf16 %v700_v4, %v699_v2  ;;  %v590_v10 = vld [vmem:[#allocation7 + $0x98] sm:$0xff]  ;;  %s1194_s15 = scalar_lea.sflag [#allocation4], %s2749_s17  ;;  %s1199_s27 = scalar_lea.sflag [#allocation16], %s2749_s17 }
 0x101   : > { %v1760_v8 = vpack.c.bf16 %v572_v6, %v571_v5  ;;  %v701_v11 = vld [vmem:[#allocation8 + $0x10] sm:$0xff]  ;;  %1759 = vmatprep.subr.bf16.mxu0 %v1758_v3  ;;  %v1762_v12 = vpack.c.bf16 %v590_v10, %v589_v9  ;;  %v702_v13 = vld [vmem:[#allocation8 + $0x18] sm:$0xff]  ;;  %v591_v18 = vld [vmem:[#allocation7 + $0xa0] sm:$0xff]  ;;  %s3009_s16 = sld [smem:[#allocation27_spill]] }
 0x102   : > { %v573_v14 = vld [vmem:[#allocation7 + $0x10] sm:$0xff]  ;;  %v574_v15 = vld [vmem:[#allocation7 + $0x18] sm:$0xff]  ;;  %1791 = vmatprep.subr.bf16.mxu1 %v1790_v7  ;;  %v1794_v16 = vpack.c.bf16 %v702_v13, %v701_v11  ;;  %v592_v19 = vld [vmem:[#allocation7 + $0xa8] sm:$0xff] }
 0x103   : > { %1761 = vmatpush3.bf16.msra.mxu0 %v1760_v8  ;;  %v1764_v17 = vpack.c.bf16 %v574_v15, %v573_v14  ;;  %v703_v20 = vld [vmem:[#allocation8 + $0x20] sm:$0xff]  ;;  %1793 = vmatpush3.bf16.msra.mxu1 %v1790_v7  ;;  %v1766_v21 = vpack.c.bf16 %v592_v19, %v591_v18  ;;  %v704_v22 = vld [vmem:[#allocation8 + $0x28] sm:$0xff]  ;;  %v593_v26 = vld [vmem:[#allocation7 + $0xb0] sm:$0xff] }
 0x104   : > { %1763 = vmatprep.subr.bf16.mxu0 %v1762_v12  ;;  %v575_v23 = vld [vmem:[#allocation7 + $0x20] sm:$0xff]  ;;  %v576_v24 = vld [vmem:[#allocation7 + $0x28] sm:$0xff]  ;;  %1795 = vmatprep.subr.bf16.mxu1 %v1794_v16  ;;  %v1798_v25 = vpack.c.bf16 %v704_v22, %v703_v20  ;;  %v594_v27 = vld [vmem:[#allocation7 + $0xb8] sm:$0xff] }
 0x105   : > { %v705_v28 = vld [vmem:[#allocation8 + $0x30] sm:$0xff]  ;;  %v706_v29 = vld [vmem:[#allocation8 + $0x38] sm:$0xff]  ;;  %v1768_v30 = vpack.c.bf16 %v576_v24, %v575_v23  ;;  %v1770_v31 = vpack.c.bf16 %v594_v27, %v593_v26  ;;  %v595_v35 = vld [vmem:[#allocation7 + $0xc0] sm:$0xff] }
 0x106   : > { %v577_v32 = vld [vmem:[#allocation7 + $0x30] sm:$0xff]  ;;  %v578_v33 = vld [vmem:[#allocation7 + $0x38] sm:$0xff]  ;;  %v1802_v34 = vpack.c.bf16 %v706_v29, %v705_v28  ;;  %v596_v36 = vld [vmem:[#allocation7 + $0xc8] sm:$0xff] }
 0x107   : > { %1765 = vmatpush3.bf16.msra.mxu0 %v1764_v17  ;;  %1797 = vmatpush3.bf16.msra.mxu1 %v1794_v16  ;;  %v707_v37 = vld [vmem:[#allocation8 + $0x40] sm:$0xff]  ;;  %v708_v38 = vld [vmem:[#allocation8 + $0x48] sm:$0xff]  ;;  %v1772_v39 = vpack.c.bf16 %v578_v33, %v577_v32  ;;  %v1774_v40 = vpack.c.bf16 %v596_v36, %v595_v35  ;;  %v597_v44 = vld [vmem:[#allocation7 + $0xd0] sm:$0xff]  ;;  %p3010_p13 = scmp.ne.s32.totalorder %s3009_s16, 0 }
 0x108   : > { %1767 = vmatprep.subr.bf16.mxu0 %v1766_v21  ;;  %1799 = vmatprep.subr.bf16.mxu1 %v1798_v25  ;;  %v579_v41 = vld [vmem:[#allocation7 + $0x40] sm:$0xff]  ;;  %v580_v42 = vld [vmem:[#allocation7 + $0x48] sm:$0xff]  ;;  %v1806_v43 = vpack.c.bf16 %v708_v38, %v707_v37  ;;  %v598_v45 = vld [vmem:[#allocation7 + $0xd8] sm:$0xff]  ;;  %s1462_s11 = sshll.u32 (%p3010_p13), %s2487_s21, 2 }
 0x109   : > { %v709_v46 = vld [vmem:[#allocation8 + $0x50] sm:$0xff]  ;;  %v710_v47 = vld [vmem:[#allocation8 + $0x58] sm:$0xff]  ;;  %v1776_v48 = vpack.c.bf16 %v580_v42, %v579_v41  ;;  %v564_v49 = vld [vmem:[%s2753_s23 + $0x8] sm:$0xff]  ;;  %v1778_v51 = vpack.c.bf16 %v598_v45, %v597_v44 }
 0x10a   : > { %v695_v50 = vld [vmem:[%s2764_s24] sm:$0xff]  ;;  %v581_v52 = vld [vmem:[#allocation7 + $0x50] sm:$0xff]  ;;  %v582_v53 = vld [vmem:[#allocation7 + $0x58] sm:$0xff]  ;;  %v1810_v54 = vpack.c.bf16 %v710_v47, %v709_v46  ;;  %674 = vmatprep.mubr.f32.mxu0 %v564_v49 }
 0x10b   : > { %1769 = vmatpush3.bf16.msra.mxu0 %v1768_v30  ;;  %1801 = vmatpush3.bf16.msra.mxu1 %v1798_v25  ;;  %v599_v55 = vld [vmem:[#allocation7 + $0xe0] sm:$0xff]  ;;  %v600_v56 = vld [vmem:[#allocation7 + $0xe8] sm:$0xff]  ;;  %v1780_v59 = vpack.c.bf16 %v582_v53, %v581_v52  ;;  %v601_v0 = vld [vmem:[#allocation7 + $0xf0] sm:$0xff] }
 0x10c   : > { %1771 = vmatprep.subr.bf16.mxu0 %v1770_v31  ;;  %1803 = vmatprep.subr.bf16.mxu1 %v1802_v34  ;;  %v711_v57 = vld [vmem:[#allocation8 + $0x60] sm:$0xff]  ;;  %v712_v58 = vld [vmem:[#allocation8 + $0x68] sm:$0xff]  ;;  %v1782_v60 = vpack.c.bf16 %v600_v56, %v599_v55  ;;  %v602_v1 = vld [vmem:[#allocation7 + $0xf8] sm:$0xff] }
 0x10d   : > { %1638 = vmatprep.mubr.f32.mxu1 %v695_v50  ;;  %v583_v61 = vld [vmem:[#allocation7 + $0x60] sm:$0xff]  ;;  %v584_v62 = vld [vmem:[#allocation7 + $0x68] sm:$0xff]  ;;  %v1814_v63 = vpack.c.bf16 %v712_v58, %v711_v57  ;;  %v713_v2 = vld [vmem:[#allocation8 + $0x70] sm:$0xff]  ;;  %v1786_v5 = vpack.c.bf16 %v602_v1, %v601_v0 }
 0x10e   : > { %v714_v3 = vld [vmem:[#allocation8 + $0x78] sm:$0xff]  ;;  %v1784_v4 = vpack.c.bf16 %v584_v62, %v583_v61  ;;  %v585_v6 = vld [vmem:[#allocation7 + $0x70] sm:$0xff]  ;;  %v823_v9 = vld [vmem:[#allocation11] sm:$0xff] }
 0x10f   : > { %1773 = vmatpush3.bf16.msra.mxu0 %v1772_v39  ;;  %1805 = vmatpush3.bf16.msra.mxu1 %v1802_v34  ;;  %v586_v7 = vld [vmem:[#allocation7 + $0x78] sm:$0xff]  ;;  %v1818_v8 = vpack.c.bf16 %v714_v3, %v713_v2  ;;  %v824_v10 = vld [vmem:[#allocation11 + $0x8] sm:$0xff]  ;;  %v825_v13 = vld [vmem:[#allocation11 + $0x10] sm:$0xff] }
 0x110   : > { %1775 = vmatprep.subr.bf16.mxu0 %v1774_v40  ;;  %1807 = vmatprep.subr.bf16.mxu1 %v1806_v43  ;;  %v1788_v11 = vpack.c.bf16 %v586_v7, %v585_v6  ;;  %v1822_v12 = vpack.c.bf16 %v824_v10, %v823_v9  ;;  %v826_v14 = vld [vmem:[#allocation11 + $0x18] sm:$0xff]  ;;  %v563_v15 = vld [vmem:[%s2753_s23] sm:$0xff]  ;;  %v696_v16 = vld [vmem:[%s2764_s24 + $0x8] sm:$0xff] }
 0x111   : > { %v566_v17 = vld [vmem:[%s2753_s23 + $0x18] sm:$0xff]  ;;  %v697_v18 = vld [vmem:[%s2764_s24 + $0x10] sm:$0xff]  ;;  %v1826_v19 = vpack.c.bf16 %v826_v14, %v825_v13  ;;  %v827_v20 = vld [vmem:[#allocation11 + $0x20] sm:$0xff] }
 0x112   : > { %v828_v21 = vld [vmem:[#allocation11 + $0x28] sm:$0xff]  ;;  %v565_v22 = vld [vmem:[%s2753_s23 + $0x10] sm:$0xff]  ;;  %v698_v24 = vld [vmem:[%s2764_s24 + $0x18] sm:$0xff] }
 0x113   : > { %1777 = vmatpush3.bf16.msra.mxu0 %v1776_v48  ;;  %1809 = vmatpush3.bf16.msra.mxu1 %v1806_v43  ;;  %v568_v23 = vld [vmem:[%s2753_s23 + $0x28] sm:$0xff]  ;;  %v1830_v25 = vpack.c.bf16 %v828_v21, %v827_v20  ;;  %v829_v26 = vld [vmem:[#allocation11 + $0x30] sm:$0xff]  ;;  %v830_v27 = vld [vmem:[#allocation11 + $0x38] sm:$0xff] }
 0x114   : > { %1779 = vmatprep.subr.bf16.mxu0 %v1778_v51  ;;  %1811 = vmatprep.subr.bf16.mxu1 %v1810_v54  ;;  %v567_v28 = vld [vmem:[%s2753_s23 + $0x20] sm:$0xff]  ;;  %v570_v29 = vld [vmem:[%s2753_s23 + $0x38] sm:$0xff]  ;;  %v1834_v30 = vpack.c.bf16 %v830_v27, %v829_v26  ;;  %v832_v32 = vld [vmem:[#allocation11 + $0x48] sm:$0xff] }
 0x115   : > { %v831_v31 = vld [vmem:[#allocation11 + $0x40] sm:$0xff]  ;;  %v569_v33 = vld [vmem:[%s2753_s23 + $0x30] sm:$0xff]  ;;  %v834_v36 = vld [vmem:[#allocation11 + $0x58] sm:$0xff]  ;;  %s1207_s23 = ssub.s32 (%p3010_p13), 13, %s1462_s11 }
 0x116   : > { %v1838_v34 = vpack.c.bf16 %v832_v32, %v831_v31  ;;  %v833_v35 = vld [vmem:[#allocation11 + $0x50] sm:$0xff]  ;;  %v835_v38 = vld [vmem:[#allocation11 + $0x60] sm:$0xff]  ;;  %v836_v39 = vld [vmem:[#allocation11 + $0x68] sm:$0xff]  ;;  %p1208_p12 = scmp.lt.s32.totalorder (%p3010_p13), %s1207_s23, 4 }
 0x117   : > { %1781 = vmatpush3.bf16.msra.mxu0 %v1780_v59  ;;  %1813 = vmatpush3.bf16.msra.mxu1 %v1810_v54  ;;  %v1842_v37 = vpack.c.bf16 %v834_v36, %v833_v35  ;;  %v1846_v40 = vpack.c.bf16 %v836_v39, %v835_v38  ;;  %v837_v41 = vld [vmem:[#allocation11 + $0x70] sm:$0xff]  ;;  %v838_v42 = vld [vmem:[#allocation11 + $0x78] sm:$0xff]  ;;  %v807_v44 = vld [vmem:[#allocation10] sm:$0xff] }
 0x118   : > { %1783 = vmatprep.subr.bf16.mxu0 %v1782_v60  ;;  %1815 = vmatprep.subr.bf16.mxu1 %v1814_v63  ;;  %v1850_v43 = vpack.c.bf16 %v838_v42, %v837_v41  ;;  %v808_v45 = vld [vmem:[#allocation10 + $0x8] sm:$0xff]  ;;  %v1450_v48 = vld [vmem:[%s2962_s5] ss:$0 sm:$0xff]  ;;  %v809_v52 = vld [vmem:[#allocation10 + $0x10] sm:$0xff] }
 0x119   : > { %v1854_v46 = vpack.c.bf16 %v808_v45, %v807_v44  ;;  %v1449_v50 = vld [vmem:[%s3007_s25] ss:$0 sm:$0xff]  ;;  %v810_v53 = vld [vmem:[#allocation10 + $0x18] sm:$0xff]  ;;  %v820_v31 = vld [vmem:[#allocation10 + $0x68] sm:$0xff] }
 0x11a   : > { %v1858_v60 = vpack.c.bf16 %v810_v53, %v809_v52  ;;  %v811_v62 = vld [vmem:[#allocation10 + $0x20] sm:$0xff]  ;;  %v814_v9 = vld [vmem:[#allocation10 + $0x38] sm:$0xff]  ;;  %v821_v35 = vld [vmem:[#allocation10 + $0x70] sm:$0xff] }
 0x11b   : > { %1785 = vmatpush3.bf16.msra.mxu0 %v1784_v4  ;;  %1817 = vmatpush3.bf16.msra.mxu1 %v1814_v63  ;;  %v812_v63 = vld [vmem:[#allocation10 + $0x28] sm:$0xff]  ;;  %v822_v36 = vld [vmem:[#allocation10 + $0x78] sm:$0xff]  ;;  %v1053_v42 = vld [vmem:[#allocation13] sm:$0xff] }
 0x11c   : > { %1787 = vmatprep.subr.bf16.mxu0 %v1786_v5  ;;  %1819 = vmatprep.subr.bf16.mxu1 %v1818_v8  ;;  %v1862_v6 = vpack.c.bf16 %v812_v63, %v811_v62  ;;  %v1055_v45 = vld [vmem:[#allocation13 + $0x10] sm:$0xff]  ;;  %v1060_v52 = vld [vmem:[#allocation13 + $0x38] sm:$0xff] }
 0x11d   : > { %v1067_v63 = vld [vmem:[#allocation13 + $0x70] sm:$0xff] }
 0x11f   : > { %1789 = vmatpush3.bf16.msra.mxu0 %v1788_v11  ;;  %1821 = vmatpush3.bf16.msra.mxu1 %v1818_v8  ;;  %v813_v8 = vld [vmem:[#allocation10 + $0x30] sm:$0xff] }
 0x120   : > { %1823 = vmatprep.subr.bf16.mxu0 %v1822_v12 }
 0x122   : > { %675 = vmatmul.mubr.f32.vlgmr.msra.gmra.mrb[0].mxu0 %v563_v15  ;;  %1639 = vmatmul.mubr.f32.vlgmr.msra.gmra.mrb[0].mxu1 %v696_v16  ;;  %v815_v15 = vld [vmem:[#allocation10 + $0x40] sm:$0xff]  ;;  %v816_v16 = vld [vmem:[#allocation10 + $0x48] sm:$0xff] }
 0x123   : > { %679 = vmatprep.mubr.f32.mxu0 %v566_v17  ;;  %1641 = vmatprep.mubr.f32.mxu1 %v697_v18  ;;  %v1870_v21 = vpack.c.bf16 %v816_v16, %v815_v15 }
 0x124   : > { %1825 = vmatpush3.bf16.msra.mxu0 %v1822_v12  ;;  %v1866_v12 = vpack.c.bf16 %v814_v9, %v813_v8 }
 0x125   : > { %1827 = vmatprep.subr.bf16.mxu0 %v1826_v19 }
 0x126   : > { %680 = vmatmul.mubr.f32.gmra.mrb[2].mxu0 %v565_v22  ;;  %1642 = vmatmul.mubr.f32.gmra.mrb[2].mxu1 %v698_v24  ;;  %v818_v24 = vld [vmem:[#allocation10 + $0x58] sm:$0xff] }
 0x127   : > { %684 = vmatprep.mubr.f32.mxu0 %v568_v23  ;;  %v817_v23 = vld [vmem:[#allocation10 + $0x50] sm:$0xff] }
 0x128   : > { %1829 = vmatpush3.bf16.msra.mxu0 %v1826_v19 }
 0x129   : > { %1831 = vmatprep.subr.bf16.mxu0 %v1830_v25 }
 0x12a   : > { %685 = vmatmul.mubr.f32.gmra.mrb[4].mxu0 %v567_v28  ;;  %v1874_v28 = vpack.c.bf16 %v818_v24, %v817_v23 }
 0x12b   : > { %689 = vmatprep.mubr.f32.mxu0 %v570_v29 }
 0x12c   : > { %1833 = vmatpush3.bf16.msra.mxu0 %v1830_v25 }
 0x12d   : > { %1835 = vmatprep.subr.bf16.mxu0 %v1834_v30 }
 0x12e   : > { %690 = vmatmul.mubr.f32.gmra.mrb[6].mxu0 %v569_v33 }
 0x130   : > { %1837 = vmatpush3.bf16.msra.mxu0 %v1834_v30  ;;  %v819_v30 = vld [vmem:[#allocation10 + $0x60] sm:$0xff] }
 0x131   : > { %1839 = vmatprep.subr.bf16.mxu0 %v1838_v34 }
 0x134   : > { %1841 = vmatpush3.bf16.msra.mxu0 %v1838_v34  ;;  %v1878_v34 = vpack.c.bf16 %v820_v31, %v819_v30 }
 0x135   : > { %1843 = vmatprep.subr.bf16.mxu0 %v1842_v37 }
 0x138   : > { %1845 = vmatpush3.bf16.msra.mxu0 %v1842_v37 }
 0x139   : > { %1847 = vmatprep.subr.bf16.mxu0 %v1846_v40 }
 0x13c   : > { %1849 = vmatpush3.bf16.msra.mxu0 %v1846_v40  ;;  %v1882_v40 = vpack.c.bf16 %v822_v36, %v821_v35 }
 0x13d   : > { %1851 = vmatprep.subr.bf16.mxu0 %v1850_v43 }
 0x140   : > { %1853 = vmatpush3.bf16.msra.mxu0 %v1850_v43  ;;  %v1054_v43 = vld [vmem:[#allocation13 + $0x8] sm:$0xff] }
 0x141   : > { %1855 = vmatprep.subr.bf16.mxu0 %v1854_v46  ;;  %v1886_v44 = vpack.c.bf16 %v1054_v43, %v1053_v42 }
 0x143   : > { %1887 = vmatprep.subr.bf16.mxu1 %v1886_v44 }
 0x144   : > { %1889 = vmatpush3.bf16.msra.mxu1 %v1886_v44 }
 0x1f5   : > { %v1514_v47 = vpop.f32.mrb[0].mxu0  ;;  %v1640_v49 = vpop.f32.mrb[0].mxu1 }
 0x1f6   : > { %v1515_v51 = vpop.f32.mrb[1].mxu0  ;;  %v788_v55 = vpop.f32.mrb[1].mxu1  ;;  %v794_v57 = vadd.f32 %v1640_v49, %v1450_v48  ;;  %v1058_v49 = vld [vmem:[#allocation13 + $0x28] sm:$0xff] }
 0x1f7   : > { %v1516_v54 = vadd.f32 %v1515_v51, %v1514_v47  ;;  %v789_v56 = vadd.f32 %v1450_v48, %v788_v55  ;;  %v1059_v51 = vld [vmem:[#allocation13 + $0x30] sm:$0xff]  ;;  %v1062_v55 = vld [vmem:[#allocation13 + $0x48] sm:$0xff] }
 0x1f8   : > { %v1898_v53 = vpack.c.bf16 %v1060_v52, %v1059_v51 }
 0x1f9   : > { %v677_v58 = vadd.f32 %v1516_v54, %v1449_v50  ;;  %v1517_v59 = vpop.f32.mrb[2].mxu0  ;;  %2027 = vtanh.f32 %v789_v56  ;;  %1676 = vmatprep.mubr.f32.mxu0 %v789_v56  ;;  %v1643_v0 = vpop.f32.mrb[2].mxu1  ;;  %v1061_v54 = vld [vmem:[#allocation13 + $0x40] sm:$0xff] }
 0x1fa   : > { %v1518_v61 = vpop.f32.mrb[3].mxu0  ;;  %1677 = vmatmul.mubr.f32.vlgmr.msra.gmra.mrb[8].mxu0 %v794_v57  ;;  %v804_v2 = vadd.f32 %v1643_v0, %v1450_v48  ;;  %v798_v3 = vpop.f32.mrb[3].mxu1  ;;  %v1902_v56 = vpack.c.bf16 %v1062_v55, %v1061_v54  ;;  %v1068_v0 = vld [vmem:[#allocation13 + $0x78] sm:$0xff] }
 0x1fb   : > { %2029 = vtanh.f32 %v677_v58  ;;  %v1519_v1 = vadd.f32 %v1518_v61, %v1517_v59  ;;  %1857 = vmatpush3.bf16.msra.mxu0 %v1854_v46  ;;  %v799_v4 = vadd.f32 %v1450_v48, %v798_v3  ;;  %v1056_v46 = vld [vmem:[#allocation13 + $0x18] sm:$0xff]  ;;  %v1057_v48 = vld [vmem:[#allocation13 + $0x20] sm:$0xff]  ;;  %v1066_v61 = vld [vmem:[#allocation13 + $0x68] sm:$0xff] }
 0x1fc   : > { %1859 = vmatprep.subr.bf16.mxu0 %v1858_v60  ;;  %2031 = vtanh.f32 %v794_v57  ;;  %v1890_v47 = vpack.c.bf16 %v1056_v46, %v1055_v45  ;;  %v1063_v57 = vld [vmem:[#allocation13 + $0x50] sm:$0xff] }
 0x1fd   : > { %v682_v5 = vadd.f32 %v1519_v1, %v1449_v50  ;;  %v1520_v7 = vpop.f32.mrb[4].mxu0  ;;  %1679 = vmatprep.mubr.f32.mxu0 %v799_v4  ;;  %v1914_v1 = vpack.c.bf16 %v1068_v0, %v1067_v63 }
 0x1fe   : > { %v1521_v10 = vpop.f32.mrb[5].mxu0  ;;  %1680 = vmatmul.mubr.f32.gmra.mrb[10].mxu0 %v804_v2  ;;  %1891 = vmatprep.subr.bf16.mxu1 %v1890_v47 }
 0x1ff   : > { %2033 = vtanh.f32 %v682_v5  ;;  %v1522_v11 = vadd.f32 %v1521_v10, %v1520_v7  ;;  %1861 = vmatpush3.bf16.msra.mxu0 %v1858_v60  ;;  %1714 = vmatprep.mubr.f32.mxu0 %v677_v58  ;;  %v1064_v58 = vld [vmem:[#allocation13 + $0x58] sm:$0xff]  ;;  %v1065_v60 = vld [vmem:[#allocation13 + $0x60] sm:$0xff] }
 0x200   : > { %1863 = vmatprep.subr.bf16.mxu0 %v1862_v6  ;;  %2035 = vtanh.f32 %v799_v4  ;;  %1893 = vmatpush3.bf16.msra.mxu1 %v1890_v47  ;;  %v1906_v59 = vpack.c.bf16 %v1064_v58, %v1063_v57  ;;  %v1910_v62 = vpack.c.bf16 %v1066_v61, %v1065_v60 }
 0x201   : > { %v687_v13 = vadd.f32 %v1522_v11, %v1449_v50  ;;  %v1523_v14 = vpop.f32.mrb[6].mxu0 }
 0x202   : > { %v1524_v17 = vpop.f32.mrb[7].mxu0 }
 0x203   : > { %2037 = vtanh.f32 %v687_v13  ;;  %v1525_v18 = vadd.f32 %v1524_v17, %v1523_v14  ;;  %v2800_v19 = vpop.eup %2027  ;;  %1865 = vmatpush3.bf16.msra.mxu0 %v1862_v6 }
 0x204   : > { %1867 = vmatprep.subr.bf16.mxu0 %v1866_v12  ;;  %2039 = vtanh.f32 %v804_v2 }
 0x205   : > { %v2802_v20 = vpop.eup %2029  ;;  %v692_v22 = vadd.f32 %v1525_v18, %v1449_v50  ;;  %v1894_v50 = vpack.c.bf16 %v1058_v49, %v1057_v48 }
 0x206   : > { %v1041_v25 = vsub.f32 %v2802_v20, %v2800_v19  ;;  %v2806_v26 = vpop.eup %2031 }
 0x207   : > { %2041 = vtanh.f32 %v692_v22  ;;  %1869 = vmatpush3.bf16.msra.mxu0 %v1866_v12  ;;  %1895 = vmatprep.subr.bf16.mxu1 %v1894_v50 }
 0x208   : > { %1871 = vmatprep.subr.bf16.mxu0 %v1870_v21  ;;  %1897 = vmatpush3.bf16.msra.mxu1 %v1894_v50 }
 0x209   : > { %v2808_v27 = vpop.eup %2033  ;;  %1899 = vmatprep.subr.bf16.mxu1 %v1898_v53 }
 0x20a   : > { %v1042_v29 = vsub.f32 %v2808_v27, %v2806_v26  ;;  %v2812_v32 = vpop.eup %2035 }
 0x20b   : > { %1873 = vmatpush3.bf16.msra.mxu0 %v1870_v21 }
 0x20c   : > { %1875 = vmatprep.subr.bf16.mxu0 %v1874_v28  ;;  %1901 = vmatpush3.bf16.msra.mxu1 %v1898_v53 }
 0x20d   : > { %v2814_v33 = vpop.eup %2037  ;;  %1903 = vmatprep.subr.bf16.mxu1 %v1902_v56 }
 0x20e   : > { %v1043_v37 = vsub.f32 %v2814_v33, %v2812_v32  ;;  %v2818_v38 = vpop.eup %2039 }
 0x20f   : > { %1877 = vmatpush3.bf16.msra.mxu0 %v1874_v28 }
 0x210   : > { %1879 = vmatprep.subr.bf16.mxu0 %v1878_v34  ;;  %1905 = vmatpush3.bf16.msra.mxu1 %v1902_v56 }
 0x211   : > { %v2820_v39 = vpop.eup %2041  ;;  %1907 = vmatprep.subr.bf16.mxu1 %v1906_v59 }
 0x212   : > { %v1044_v41 = vsub.f32 %v2820_v39, %v2818_v38 }
 0x213   : > { %1881 = vmatpush3.bf16.msra.mxu0 %v1878_v34 }
 0x214   : > { %1883 = vmatprep.subr.bf16.mxu0 %v1882_v40  ;;  %1909 = vmatpush3.bf16.msra.mxu1 %v1906_v59 }
 0x215   : > { %1911 = vmatprep.subr.bf16.mxu1 %v1910_v62 }
 0x217   : > { %1885 = vmatpush3.bf16.msra.mxu0 %v1882_v40 }
 0x218   : > { %1913 = vmatpush3.bf16.msra.mxu1 %v1910_v62 }
 0x219   : > { %1915 = vmatprep.subr.bf16.mxu1 %v1914_v1 }
 0x21a   : > { %1715 = vmatmul.mubr.f32.vlgmr.msra.gmra.mrb[8].mxu0 %v682_v5 }
 0x21b   : > { %1717 = vmatprep.mubr.f32.mxu0 %v687_v13 }
 0x21c   : > { %1917 = vmatpush3.bf16.msra.mxu1 %v1914_v1 }
 0x21e   : > { %1718 = vmatmul.mubr.f32.gmra.mrb[10].mxu0 %v692_v22 }
 0x2ed   : > { %v1716_v2 = vpop.f32.mrb[8].mxu0 }
 0x2ee   : > { %v1452_v3 = vmul.f32 -1.442695, %v1716_v2  ;;  %v990_v4 = vpop.f32.mrb[9].mxu0 }
 0x2ef   : > { %v1451_v5 = vmul.f32 -1.442695, %v990_v4 }
 0x2f0   : > { %2043 = vpow2.f32 %v1452_v3 }
 0x2f1   : > { %2045 = vpow2.f32 %v1451_v5  ;;  %v1719_v6 = vpop.f32.mrb[10].mxu0 }
 0x2f2   : > { %v1454_v7 = vmul.f32 -1.442695, %v1719_v6  ;;  %v1000_v8 = vpop.f32.mrb[11].mxu0 }
 0x2f3   : > { %v1453_v9 = vmul.f32 -1.442695, %v1000_v8 }
 0x2f4   : > { %2047 = vpow2.f32 %v1454_v7 }
 0x2f5   : > { %2049 = vpow2.f32 %v1453_v9 }
 0x2fa   : > { %v2044_v10 = vpop.eup %2043 }
 0x2fb   : > { %v2046_v11 = vpop.eup %2045  ;;  %v1022_v12 = vadd.f32 1.0, %v2044_v10 }
 0x2fc   : > { %v1021_v13 = vadd.f32 1.0, %v2046_v11 }
 0x2fd   : > { %2051 = vrcp.f32 %v1022_v12 }
 0x2fe   : > { %v2048_v14 = vpop.eup %2047  ;;  %2053 = vrcp.f32 %v1021_v13 }
 0x2ff   : > { %v2050_v15 = vpop.eup %2049  ;;  %v1024_v16 = vadd.f32 1.0, %v2048_v14 }
 0x300   : > { %v1023_v17 = vadd.f32 1.0, %v2050_v15 }
 0x301   : > { %2055 = vrcp.f32 %v1024_v16 }
 0x302   : > { %2057 = vrcp.f32 %v1023_v17 }
 0x307   : > { %v2052_v18 = vpop.eup %2051 }
 0x308   : > { %v2054_v21 = vpop.eup %2053  ;;  %1190 = vst [vmem:[%s2825_s14 + $0x8] sm:$0xff] %v2052_v18  ;;  %v1046_v22 = vmul.f32 %v2052_v18, %v1042_v29 }
 0x309   : > { %1189 = vst [vmem:[%s2825_s14] sm:$0xff] %v2054_v21  ;;  %v1045_v23 = vmul.f32 %v2054_v21, %v1041_v25 }
 0x30a   : > { %v1050_v24 = vadd.f32 %v2806_v26, %v1046_v22 }
 0x30b   : > { %v2056_v28 = vpop.eup %2055  ;;  %v1049_v30 = vadd.f32 %v2800_v19, %v1045_v23  ;;  %v1455_v19 = vld [vmem:[%s3008_s29] ss:$0 sm:$0xff] }
 0x30c   : > { %v2058_v31 = vpop.eup %2057  ;;  %1192 = vst [vmem:[%s2825_s14 + $0x18] sm:$0xff] %v2056_v28  ;;  %v1048_v34 = vmul.f32 %v2056_v28, %v1044_v41 }
 0x30d   : > { %1191 = vst [vmem:[%s2825_s14 + $0x10] sm:$0xff] %v2058_v31  ;;  %1752 = vmatprep.mubr.f32.mxu1 %v1049_v30  ;;  %v1047_v27 = vmul.f32 %v2058_v31, %v1043_v37 }
 0x30e   : > { %1753 = vmatmul.mubr.f32.vlgmr.msra.gmra.mrb[4].mxu1 %v1050_v24  ;;  %v1052_v20 = vadd.f32 %v2818_v38, %v1048_v34 }
 0x30f   : > { %v1051_v25 = vadd.f32 %v2812_v32, %v1047_v27 }
 0x311   : > { %1755 = vmatprep.mubr.f32.mxu1 %v1051_v25 }
 0x312   : > { %1756 = vmatmul.mubr.f32.gmra.mrb[6].mxu1 %v1052_v20 }
 0x3e1   : > { %v1754_v26 = vpop.f32.mrb[4].mxu1 }
 0x3e2   : > { %v1148_v29 = vadd.f32 %v1754_v26, %v1455_v19  ;;  %v1142_v35 = vpop.f32.mrb[5].mxu1 }
 0x3e3   : > { %v1143_v36 = vadd.f32 %v1455_v19, %v1142_v35 }
 0x3e4   : > { %v1457_v39 = vmul.f32 -1.442695, %v1148_v29 }
 0x3e5   : > { %v1456_v40 = vmul.f32 -1.442695, %v1143_v36  ;;  %v1757_v41 = vpop.f32.mrb[6].mxu1 }
 0x3e6   : > { %2059 = vpow2.f32 %v1457_v39  ;;  %v1158_v33 = vadd.f32 %v1757_v41, %v1455_v19  ;;  %v1152_v37 = vpop.f32.mrb[7].mxu1 }
 0x3e7   : > { %2061 = vpow2.f32 %v1456_v40  ;;  %v1153_v38 = vadd.f32 %v1455_v19, %v1152_v37 }
 0x3e8   : > { %v1459_v42 = vmul.f32 -1.442695, %v1158_v33 }
 0x3e9   : > { %v1458_v32 = vmul.f32 -1.442695, %v1153_v38 }
 0x3ea   : > { %2063 = vpow2.f32 %v1459_v42 }
 0x3eb   : > { %2065 = vpow2.f32 %v1458_v32 }
 0x3f0   : > { %v2060_v43 = vpop.eup %2059 }
 0x3f1   : > { %v2062_v44 = vpop.eup %2061  ;;  %v1174_v45 = vadd.f32 1.0, %v2060_v43 }
 0x3f2   : > { %v1173_v46 = vadd.f32 1.0, %v2062_v44 }
 0x3f3   : > { %2067 = vrcp.f32 %v1174_v45 }
 0x3f4   : > { %v2064_v47 = vpop.eup %2063  ;;  %2069 = vrcp.f32 %v1173_v46 }
 0x3f5   : > { %v2066_v48 = vpop.eup %2065  ;;  %v1176_v49 = vadd.f32 1.0, %v2064_v47 }
 0x3f6   : > { %v1175_v50 = vadd.f32 1.0, %v2066_v48 }
 0x3f7   : > { %2071 = vrcp.f32 %v1176_v49 }
 0x3f8   : > { %2073 = vrcp.f32 %v1175_v50 }
 0x3fd   : > { %v2068_v51 = vpop.eup %2067  ;;  %1205 = sbr.rel (!%p3010_p13) target bundleno = 1057 (0x421), region = 92 }
 0x3fe   : > { %v2070_v52 = vpop.eup %2069  ;;  %1186 = vst [vmem:[%s534_s22 + $0x8] sm:$0xff] %v2068_v51 }
 0x3ff   : > { %1185 = vst [vmem:[%s534_s22] sm:$0xff] %v2070_v52 }
 0x401   : > { %v2072_v53 = vpop.eup %2071 }
 0x402   : > { %v2074_v54 = vpop.eup %2073  ;;  %1188 = vst [vmem:[%s534_s22 + $0x18] sm:$0xff] %v2072_v53 }
 0x403   : > { %1187 = vst [vmem:[%s534_s22 + $0x10] sm:$0xff] %v2074_v54 }
 0x404   : > { %s3028_s23 = smov (!%p1208_p12, %s1207_s23), 4 }
 0x405   : > { %s2856_s12 = sshll.u32 %s3028_s23, 7 }
 0x406   : > { %s1212_s13 = ssub.s32 512, %s2856_s12 }
 0x407   : > { %1213 = vsyncadd %s1194_s15, %s1212_s13  ;;  %p1464_p0 = scmp.ne.s32.totalorder %s2856_s12, 0  ;;  %s1480_s3 = sshll.u32 %s2487_s21, 9 }
 0x408   : > { %s3011_s10 = sld [smem:[#allocation32_spill]]  ;;  %s1218_s4 = sshll.u32 %s534_s22, 4  ;;  %s2868_s4 = int_to_ptr.vmem [resolvable:$true] %s1218_s4 }
 0x409   : > { %s2271_s25 = scalar_lea.vmem %s2868_s4, %s2856_s12  ;;  %s2400_s26 = smov [#allocation14]  }
 0x40a   : > { %p2272_p7 = scmp.ne.s32.totalorder %s2868_s4, %s2271_s25  ;;  %s2275_s9 = sshll.u32 %s2400_s26, 4  ;;  %s2276_s9 = int_to_ptr.vmem [resolvable:$false] %s2275_s9 }
 0x40b   : > { %s2277_s29 = scalar_lea.vmem %s2276_s9, 1024  ;;  %p2278_p9 = scmp.lt.s32.totalorder %s2868_s4, %s2276_s9 }
 0x40c   : > { %p2273_p8 = pnand %p2272_p7, %p1464_p0  ;;  %p2279_p1 = scmp.lt.s32.totalorder %s2277_s29, %s2271_s25 }
 0x40e   : > { %s2866_s30 = scalar_lea.hbm %s3011_s10, %s1480_s3  ;;  %p2274_p10 = pneg %p2273_p8 }
 0x40f   : > { %p2280_p2 = por %p2279_p1, %p2278_p9 }
 0x411   : > { %p2281_p4 = pnand %p2280_p2, %p2274_p10 }
 0x413   : > { %2284 = shalt.err (!%p2281_p4)
}
 0x414   : > { %s2285_s22 = scalar_lea.hbm %s2866_s30, %s2856_s12  ;;  %s2289_s23 = scalar_lea.hbm %s3011_s10, 1664 }
 0x415   : > { %p2286_p3 = scmp.ne.s32.totalorder %s2866_s30, %s2285_s22  ;;  %p2290_p11 = scmp.lt.u32.totalorder %s2866_s30, %s3011_s10 }
 0x416   : > { %p2291_p13 = scmp.lt.u32.totalorder %s2289_s23, %s2285_s22  ;;  %p2293_p7 = scmp.lt.u32.totalorder %s2285_s22, %s2866_s30 }
 0x417   : > { %p2287_p5 = pnand %p2286_p3, %p1464_p0 }
 0x418   : > { %p2292_p12 = por %p2291_p13, %p2290_p11 }
 0x419   : > { %p2288_p6 = pneg %p2287_p5 }
 0x41a   : > { %p2294_p8 = por %p2293_p7, %p2292_p12 }
 0x41c   : > { %p2295_p10 = pnand %p2294_p8, %p2288_p6 }
 0x41e   : > { %2298 = shalt.err (!%p2295_p10)
}
 0x41f   : > { %s2401_s24 = smov 128   ;;  %s2402_s28 = smov 8  }
 0x420   : > { %1224 = dma.vmem_to_hbm [thread:$0]  (%p1464_p0), %s2868_s4, %s2856_s12, %s2866_s30, %s1194_s15, %s2401_s24, %s2401_s24, %s2402_s28  }
 0x421 PF: > { %s3012_s25 = sld [smem:[#allocation27_spill]] }
 0x427   : > { %p3013_p9 = scmp.ne.s32.totalorder %s3012_s25, 0 }
 0x428   : > { %s1468_s26 = sshll.u32 (%p3013_p9), %s2487_s21, 2 }
 0x429   : > { %1227 = sbr.rel (!%p3013_p9) target bundleno = 1101 (0x44d), region = 96  ;;  %s1229_s9 = ssub.s32 (%p3013_p9), 13, %s1468_s26 }
 0x42a   : > { %p1230_p1 = scmp.lt.s32.totalorder (%p3013_p9), %s1229_s9, 4 }
 0x430   : > { %s3030_s9 = smov (!%p1230_p1, %s1229_s9), 4 }
 0x431   : > { %s2899_s29 = sshll.u32 %s3030_s9, 7 }
 0x432   : > { %s1234_s22 = ssub.s32 512, %s2899_s29 }
 0x433   : > { %1235 = vsyncadd %s1199_s27, %s1234_s22  ;;  %p1470_p0 = scmp.ne.s32.totalorder %s2899_s29, 0  ;;  %s1481_s15 = sshll.u32 %s2487_s21, 9 }
 0x434   : > { %s3014_s4 = sld [smem:[#allocation33_spill]]  ;;  %s1240_s11 = sshll.u32 %s2825_s14, 4  ;;  %s2912_s11 = int_to_ptr.vmem [resolvable:$true] %s1240_s11 }
 0x435   : > { %s2299_s23 = scalar_lea.vmem %s2912_s11, %s2899_s29  ;;  %s2403_s13 = smov [#allocation15]  }
 0x436   : > { %p2300_p2 = scmp.ne.s32.totalorder %s2912_s11, %s2299_s23  ;;  %s2303_s3 = sshll.u32 %s2403_s13, 4  ;;  %s2304_s3 = int_to_ptr.vmem [resolvable:$false] %s2303_s3 }
 0x437   : > { %s2305_s21 = scalar_lea.vmem %s2304_s3, 1024  ;;  %p2306_p5 = scmp.lt.s32.totalorder %s2912_s11, %s2304_s3 }
 0x438   : > { %p2301_p4 = pnand %p2300_p2, %p1470_p0  ;;  %p2307_p6 = scmp.lt.s32.totalorder %s2305_s21, %s2299_s23 }
 0x43a   : > { %s2909_s16 = scalar_lea.hbm %s3014_s4, %s1481_s15  ;;  %p2302_p3 = pneg %p2301_p4 }
 0x43b   : > { %p2308_p11 = por %p2307_p6, %p2306_p5 }
 0x43d   : > { %p2309_p13 = pnand %p2308_p11, %p2302_p3 }
 0x43f   : > { %2312 = shalt.err (!%p2309_p13)
}
 0x440   : > { %s2313_s14 = scalar_lea.hbm %s2909_s16, %s2899_s29  ;;  %s2317_s25 = scalar_lea.hbm %s3014_s4, 1664 }
 0x441   : > { %p2314_p12 = scmp.ne.s32.totalorder %s2909_s16, %s2313_s14  ;;  %p2318_p10 = scmp.lt.u32.totalorder %s2909_s16, %s3014_s4 }
 0x442   : > { %p2319_p9 = scmp.lt.u32.totalorder %s2317_s25, %s2313_s14  ;;  %p2321_p2 = scmp.lt.u32.totalorder %s2313_s14, %s2909_s16 }
 0x443   : > { %p2315_p7 = pnand %p2314_p12, %p1470_p0 }
 0x444   : > { %p2320_p1 = por %p2319_p9, %p2318_p10 }
 0x445   : > { %p2316_p8 = pneg %p2315_p7 }
 0x446   : > { %p2322_p4 = por %p2321_p2, %p2320_p1 }
 0x448   : > { %p2323_p3 = pnand %p2322_p4, %p2316_p8 }
 0x44a   : > { %2326 = shalt.err (!%p2323_p3)
}
 0x44b   : > { %s2404_s22 = smov 128   ;;  %s2405_s15 = smov 8  }
 0x44c   : > { %1246 = dma.vmem_to_hbm [thread:$0]  (%p1470_p0), %s2912_s11, %s2899_s29, %s2909_s16, %s1199_s27, %s2404_s22, %s2404_s22, %s2405_s15  }
 0x44d PF: > { %s3015_s12 = sld [smem:[#allocation24_spill]]  ;;  %s3016_s30 = sld [smem:[#allocation28_spill]] }
 0x44e   : > { %p1979_p5 = scmp.ge.s32.totalorder %s2385_s20, 2 }
 0x453   : > { %s1255_s23 = sand.u32 1, %s3015_s12   ;;  %p3017_p6 = scmp.ne.s32.totalorder %s3016_s30, 0 }
 0x454   : > { %s1256_s13 = scalar_lea.sflag [#allocation4], %s1255_s23 }
 0x455   : > { %p1963_p11 = pnand %p1979_p5, %p3017_p6 }
 0x457   : > { %2364 = dma.done.wait (!%p1963_p11), %s1256_s13, 512  }
 0x458   : > { %2366 = vsyncadd (!%p1963_p11), %s1256_s13, 4294966784  ;;  %s1265_s3 = scalar_lea.sflag [#allocation16], %s1255_s23 }
 0x459   : > { %2368 = dma.done.wait (!%p1963_p11), %s1265_s3, 512  }
 0x45a   : > { %2370 = vsyncadd (!%p1963_p11), %s1265_s3, 4294966784  ;;  %s3018_s20 = sld [smem:[#allocation25_spill]]  ;;  %s3019_s21 = sld [smem:[#allocation26_spill]] }
 0x45b   : > { %s3020_s17 = smov %s2377_s18  ;;  %s3021_s18 = smov %s2381_s19 }
 0x460   : > { %p33_p0 = scmp.ge.s32.totalorder %s3018_s20, 6   ;;  %s3022_s19 = smov %s3019_s21 }
 0x462   :  { %35 = sbr.rel (!%p33_p0) target bundleno = 17 (0x11), region = 155 }
 0x469   :  { %1270 = vsyncpa [#allocation3], 1 }
 0x46a   :  { %1272 = vsyncpa [#allocation3 + $0x1], 1 }
 0x46b   :  { %1273 = vsyncpa [#allocation6], 1 }
 0x46c   :  { %1275 = vsyncpa [#allocation6 + $0x1], 1 }
 0x46d   :  { %1276 = vsyncpa [#allocation9], 1 }
 0x46e   :  { %1277 = vsyncpa [#allocation12], 1 }
 0x46f   :  { %1278 = vsyncpa [#allocation4], 1 }
 0x470   :  { %1280 = vsyncpa [#allocation4 + $0x1], 1 }
 0x471   :  { %1281 = vsyncpa [#allocation16], 1 }
 0x472   :  { %1283 = vsyncpa [#allocation16 + $0x1], 1 }

</bundles_post_ra>
